<compile_context>
chip_gen: v7x
topology: tpu7x:2x2x1
jax: 0.10.0
libtpu: 0.0.40
codegen_flags: <defaults>
</compile_context>

<pallas_src>
import math
import numpy as np

import jax
import jax.numpy as jnp
from jax import lax
from jax.experimental import pallas as pl
from jax.experimental.pallas import tpu as pltpu


def _round_up(x: int, m: int) -> int:
    return ((x + m - 1) // m) * m


def _pick_tile(n: int, max_tile: int):
    """Pick a row tile (multiple of 8) that divides n when possible (no padding)."""
    max_tile = max(8, (max_tile // 8) * 8)
    if n >= 8:
        start = min(max_tile, (n // 8) * 8)
        for cand in range(start, 7, -8):
            if n % cand == 0:
                return cand, n
    tile = min(max_tile, _round_up(max(n, 1), 8))
    return tile, _round_up(max(n, 1), tile)


# ----------------------------------------------------------------------------
# Static (host-side) index math: faithful port of Slicer.compute_slice
# ----------------------------------------------------------------------------
class SlicerNP:
    def __init__(self, max_blocks: int, block_mask: np.ndarray) -> None:
        self.block_size = int(block_mask.shape[0])
        self.num_kept_tokens = int(block_mask.sum())
        kept = np.where(block_mask)[0]
        kept_indices = np.tile(kept, max_blocks)
        offsets = np.repeat(np.arange(max_blocks), self.num_kept_tokens)
        self.indices = (kept_indices + self.block_size * offsets).astype(np.int64)

    def compute_slice(self, num_steps: int, prev_steps: int = 0) -> np.ndarray:
        total_steps = num_steps + prev_steps
        num_blocks = math.ceil(total_steps / self.block_size)
        idx = self.indices[: num_blocks * self.num_kept_tokens]
        keep = (prev_steps <= idx) & (idx < total_steps)
        return (idx[keep] - prev_steps).astype(np.int64)


# ----------------------------------------------------------------------------
# Fast path: VMEM-resident table + one-hot MXU matmul
# ----------------------------------------------------------------------------
def _embed_vmem_kernel(tok_ref, table_ref, out_ref):
    # tok_ref:   (TILE, 1) int32 VMEM block -- row ids into the combined table (clamped)
    # table_ref: (V, E)    VMEM, constant index_map -> DMA'd from HBM once, stays resident
    # out_ref:   (TILE, E) pipelined VMEM output block (lane-dense when E >= 128)
    v = table_ref.shape[0]
    tile = out_ref.shape[0]
    ids = tok_ref[...]                                           # (TILE, 1)
    iota_v = lax.broadcasted_iota(jnp.int32, (tile, v), 1)       # (TILE, V)
    one_hot = (ids == iota_v).astype(table_ref.dtype)            # (TILE, V)
    out_ref[...] = jnp.dot(
        one_hot, table_ref[...], preferred_element_type=jnp.float32
    ).astype(out_ref.dtype)


def _embed_vmem_resident(tok_flat: jax.Array, table: jax.Array, tile: int) -> jax.Array:
    n = int(tok_flat.shape[0])
    v, e = table.shape
    tile, n_pad = _pick_tile(n, tile)

    tok = jnp.clip(tok_flat.astype(jnp.int32), 0, v - 1)
    if n_pad != n:
        tok = jnp.concatenate([tok, jnp.zeros((n_pad - n,), jnp.int32)], axis=0)
    tok2d = tok.reshape(n_pad, 1)

    out = pl.pallas_call(
        _embed_vmem_kernel,
        out_shape=jax.ShapeDtypeStruct((n_pad, e), table.dtype),
        grid_spec=pltpu.PrefetchScalarGridSpec(
            num_scalar_prefetch=0,
            grid=(n_pad // tile,),
            in_specs=[
                pl.BlockSpec((tile, 1), lambda i: (i, 0)),   # token ids, per-tile
                pl.BlockSpec((v, e), lambda i: (0, 0)),      # full table, loaded once
            ],
            out_specs=pl.BlockSpec((tile, e), lambda i: (i, 0)),
        ),
        compiler_params=pltpu.CompilerParams(
            dimension_semantics=("parallel",),
            vmem_limit_bytes=48 * 1024 * 1024,
        ),
    )(tok2d, table)
    return out[:n] if n_pad != n else out


# ----------------------------------------------------------------------------
# Fallback: huge-vocab HBM row gather, DMA directly into the output block
# ----------------------------------------------------------------------------
def _embed_hbm_gather_kernel(tok_smem, table_hbm, out_ref, sem_ref):
    # tok_smem:  (N_pad,) int32 scalar-prefetched to SMEM (row ids, clamped to [0, V))
    # table_hbm: (V, E)   left in HBM (memory_space=pl.ANY), V >= tile in this path
    # out_ref:   (TILE, E) pipelined VMEM output block; rows are DMA'd straight in
    # sem_ref:   (1,) DMA semaphore
    tile = out_ref.shape[0]
    base = pl.program_id(0) * tile

    def issue(r, carry):
        t = tok_smem[base + r]
        pltpu.make_async_copy(
            table_hbm.at[pl.ds(t, 1), :],
            out_ref.at[pl.ds(r, 1), :],
            sem_ref.at[0],
        ).start()
        return carry

    lax.fori_loop(0, tile, issue, 0, unroll=8)

    # Single drain: one dummy descriptor sized to the whole tile. The DMA semaphore
    # counts bytes, so waiting for TILE*E*itemsize bytes == all TILE row copies.
    pltpu.make_async_copy(
        table_hbm.at[pl.ds(0, tile), :],
        out_ref,
        sem_ref.at[0],
    ).wait()


def _embed_hbm_gather(tok_flat: jax.Array, table: jax.Array, tile: int) -> jax.Array:
    n = int(tok_flat.shape[0])
    v, e = table.shape
    tile, n_pad = _pick_tile(n, tile)
    assert v >= tile, "HBM gather path expects a large vocabulary (V >= tile)"

    # Clamp so an out-of-range token can never drive an OOB HBM DMA.
    tok = jnp.clip(tok_flat.astype(jnp.int32), 0, v - 1)
    if n_pad != n:
        tok = jnp.concatenate([tok, jnp.zeros((n_pad - n,), jnp.int32)], axis=0)

    # TODO(synk): for extremely long sequences, replace the whole-array scalar prefetch
    #             with a per-tile SMEM block to keep SMEM usage O(tile).
    out = pl.pallas_call(
        _embed_hbm_gather_kernel,
        out_shape=jax.ShapeDtypeStruct((n_pad, e), table.dtype),
        grid_spec=pltpu.PrefetchScalarGridSpec(
            num_scalar_prefetch=1,                        # token ids -> SMEM
            grid=(n_pad // tile,),
            in_specs=[pl.BlockSpec(memory_space=pl.ANY)],  # table stays in HBM
            out_specs=pl.BlockSpec((tile, e), lambda i, tok_s: (i, 0)),
            scratch_shapes=[pltpu.SemaphoreType.DMA((1,))],
        ),
        compiler_params=pltpu.CompilerParams(
            dimension_semantics=("parallel",),
            vmem_limit_bytes=32 * 1024 * 1024,
        ),
    )(tok, table)
    return out[:n] if n_pad != n else out


# ----------------------------------------------------------------------------
# Dispatch
# ----------------------------------------------------------------------------
_VMEM_TABLE_BYTES_LIMIT = 8 * 1024 * 1024   # table must fit comfortably in VMEM (v7x-safe)
_VMEM_TABLE_ROWS_LIMIT = 4096               # bounds the (tile, V) one-hot intermediate


def embed_rows_pallas(tok_flat: jax.Array, table: jax.Array, tile: int = 512) -> jax.Array:
    v, e = table.shape
    table_bytes = int(v) * int(e) * table.dtype.itemsize
    if table_bytes <= _VMEM_TABLE_BYTES_LIMIT and v <= _VMEM_TABLE_ROWS_LIMIT:
        return _embed_vmem_resident(tok_flat, table, tile)
    return _embed_hbm_gather(tok_flat, table, tile)


# ----------------------------------------------------------------------------
# Embedder forward (JAX wrapper around the Pallas hot path)
# ----------------------------------------------------------------------------
class EmbedderJAX:
    def __init__(self, max_blocks: int, block_masks, embedding_tables):
        assert len(block_masks) == len(embedding_tables)
        stacked = np.stack([np.asarray(m).astype(np.int64) for m in block_masks], 0)
        assert (stacked.sum(0) == 1).all()
        self.embedding_dim = embedding_tables[0].shape[1]
        assert all(t.shape[1] == self.embedding_dim for t in embedding_tables)
        self.tables = [jnp.asarray(t, jnp.float32) for t in embedding_tables]
        self.slicers = [SlicerNP(max_blocks, np.asarray(m).astype(bool)) for m in block_masks]
        sizes = [t.shape[0] for t in self.tables]
        self.vocab_offsets = np.concatenate([[0], np.cumsum(sizes)[:-1]]).astype(np.int32)
        self.combined_table = jnp.concatenate(self.tables, axis=0)

    def forward(self, tokens: jax.Array, num_steps: int, prev_steps: int) -> jax.Array:
        assert tokens.ndim == 2
        B, T = tokens.shape
        assert T == num_steps
        # Route each position to its table via the exact Slicer logic (static numpy).
        table_id = np.full((T,), -1, dtype=np.int32)
        for i, slicer in enumerate(self.slicers):
            s = slicer.compute_slice(num_steps, prev_steps)
            table_id[s] = i
        valid = table_id >= 0
        pos_offset = np.where(valid,
                              self.vocab_offsets[np.clip(table_id, 0, None)],
                              0).astype(np.int32)
        # Global row id into the concatenated table, per position.
        global_tok = tokens.astype(jnp.int32) + jnp.asarray(pos_offset)[None, :]
        out_flat = embed_rows_pallas(global_tok.reshape(-1), self.combined_table)
        out = out_flat.reshape(B, T, self.embedding_dim)
        if not bool(valid.all()):
            # Positions not covered by any slicer stay zero (matches torch.zeros init).
            out = out * jnp.asarray(valid, out.dtype)[None, :, None]
        return out


# ----------------------------------------------------------------------------
# Demo / correctness check
# ----------------------------------------------------------------------------
if __name__ == "__main__":
    key = jax.random.PRNGKey(0)

    # IRIS-style masking: blocks of 4 positions, first 3 = observation tokens,
    # last = action token.
    block_size = 4
    max_blocks = 4
    mask_obs = np.array([1, 1, 1, 0], dtype=bool)
    mask_act = np.array([0, 0, 0, 1], dtype=bool)
    block_masks = [mask_obs, mask_act]

    vocab_obs, vocab_act = 32, 8
    embed_dim = 128
    B, num_steps, prev_steps = 2, 8, 3     # T = num_steps; prev_steps exercises offsets

    k1, k2, k3, k4 = jax.random.split(key, 4)
    table_obs = jax.random.normal(k1, (vocab_obs, embed_dim), jnp.float32)
    table_act = jax.random.normal(k2, (vocab_act, embed_dim), jnp.float32)
    tables = [table_obs, table_act]

    embedder = EmbedderJAX(max_blocks, block_masks, tables)

    # Build tokens so each position's token id is valid for the table routing it.
    def make_tokens(k, b, t, prev):
        tid = np.full((t,), -1, dtype=np.int32)
        for i, sl in enumerate(embedder.slicers):
            tid[sl.compute_slice(t, prev)] = i
        vocab_pp = np.where(tid == 0, vocab_obs, vocab_act).astype(np.int32)
        raw = jax.random.randint(k, (b, t), 0, 1 << 20, dtype=jnp.int32)
        return raw % jnp.asarray(vocab_pp)[None, :]

    def reference(tok, t, prev):
        b = tok.shape[0]
        ref = jnp.zeros((b, t, embed_dim), jnp.float32)
        for i, sl in enumerate(embedder.slicers):
            s = sl.compute_slice(t, prev)
            if s.size:
                ref = ref.at[:, s].set(tables[i][tok[:, s]])
        return ref

    # Test 1: main config (N = B*T divides the tile -> no padding / no tail slice).
    tokens = make_tokens(k3, B, num_steps, prev_steps)
    out = jax.block_until_ready(embedder.forward(tokens, num_steps, prev_steps))
    np.testing.assert_allclose(np.asarray(out),
                               np.asarray(reference(tokens, num_steps, prev_steps)),
                               rtol=1e-5, atol=1e-5)

    # Test 2: odd length (exercises the padding / un-pad path).
    tokens2 = make_tokens(k4, 1, 5, 0)
    out2 = jax.block_until_ready(embedder.forward(tokens2, 5, 0))
    np.testing.assert_allclose(np.asarray(out2),
                               np.asarray(reference(tokens2, 5, 0)),
                               rtol=1e-5, atol=1e-5)

    print("KERNEL_OK")
</pallas_src>

<mosaic_0001>
module attributes {stable_mosaic.version = 11 : i64} {
  func.func @_embed_vmem_kernel(%arg0: i32, %arg1: memref<16x1xi32, #tpu.memory_space<vmem>>, %arg2: memref<40x128xf32, #tpu.memory_space<vmem>>, %arg3: memref<16x128xf32, #tpu.memory_space<vmem>>) attributes {dimension_semantics = [#tpu.dimension_semantics<parallel>], iteration_bounds = array<i64: 1>, scalar_prefetch = 0 : i64, scratch_operands = 0 : i64, tpu.core_type = #tpu.core_type<tc>, window_params = [{transform_indices = @transform_0, window_bounds = array<i64: 16, 1>}, {pipeline_mode = #tpu.pipeline_mode<synchronous>, transform_indices = @transform_1, window_bounds = array<i64: 40, 128>}, {transform_indices = @transform_2, window_bounds = array<i64: 16, 128>}]} {
    %c0 = arith.constant 0 : index
    %c0_0 = arith.constant 0 : index
    %0 = vector.load %arg1[%c0, %c0_0] : memref<16x1xi32, #tpu.memory_space<vmem>>, vector<16x1xi32>
    %1 = tpu.iota {dimensions = array<i32: 1>} : vector<16x40xi32>
    %2 = vector.broadcast %0 : vector<16x1xi32> to vector<16x40xi32>
    %3 = arith.cmpi eq, %2, %1 : vector<16x40xi32>
    %4 = arith.extui %3 : vector<16x40xi1> to vector<16x40xi32>
    %5 = arith.sitofp %4 : vector<16x40xi32> to vector<16x40xf32>
    %c0_1 = arith.constant 0 : index
    %c0_2 = arith.constant 0 : index
    %6 = vector.load %arg2[%c0_1, %c0_2] : memref<40x128xf32, #tpu.memory_space<vmem>>, vector<40x128xf32>
    %cst = arith.constant dense<0.000000e+00> : vector<16x128xf32>
    %7 = tpu.matmul %5, %6, %cst {dimension_numbers = #tpu.dot_dimension_numbers<[1], [0], [0], [1], [0, 0, 1, 1], [], []>} : vector<16x40xf32>, vector<40x128xf32>, vector<16x128xf32> -> vector<16x128xf32>
    %c0_3 = arith.constant 0 : index
    %c0_4 = arith.constant 0 : index
    %8 = vector.load %arg3[%c0_3, %c0_4] : memref<16x128xf32, #tpu.memory_space<vmem>>, vector<16x128xf32>
    tpu.vector_store %arg3[%c0_3, %c0_4], %7 {strides = array<i32>} : memref<16x128xf32, #tpu.memory_space<vmem>>, vector<16x128xf32>,
    return
  }
  func.func @transform_0(%arg0: i32) -> (i32, i32) {
    %c0_i32 = arith.constant 0 : i32
    %c0_i32_0 = arith.constant 0 : i32
    return %arg0, %c0_i32 : i32, i32
  }
  func.func @transform_1(%arg0: i32) -> (i32, i32) {
    %c0_i32 = arith.constant 0 : i32
    %c0_i32_0 = arith.constant 0 : i32
    %c0_i32_1 = arith.constant 0 : i32
    return %c0_i32, %c0_i32_0 : i32, i32
  }
  func.func @transform_2(%arg0: i32) -> (i32, i32) {
    %c0_i32 = arith.constant 0 : i32
    %c0_i32_0 = arith.constant 0 : i32
    return %arg0, %c0_i32 : i32, i32
  }
}

</mosaic_0001>

<bundles_post_ra>
// kernel: tpu_custom_call.1
= control target key start
LH: loop header
LB: loop body
LE: loop exit
PB: predicated region body
PF: predicated region fallthrough
CT: control target
= control target key end

     0   :  { %7 = vsyncpa [#allocation3], 0  ;;  %s292_s0 = inlined_call_operand.vmem [shape: s32[16,1], index: 0, kind: input, shape index: {}]   ;;  %s293_s1 = inlined_call_operand.hbm [shape: f32[40,128], index: 1, kind: input, shape index: {}]   ;;  %s294_s2 = inlined_call_operand.hbm [shape: f32[16,128], index: 2, kind: output, shape index: {}]  }
   0x1   :  { %8 = vsyncpa [#allocation4], 0  ;;  %s235_s9 = smov [#allocation2]   ;;  %s187_s13 = scalar_lea.hbm %s293_s1, 640 }
   0x2   :  { %s16_s10 = sshll.u32 %s235_s9, 4  ;;  %p188_p0 = scmp.ne.s32.totalorder %s293_s1, %s187_s13  ;;  %s17_s10 = int_to_ptr.vmem [resolvable:$true] %s16_s10 }
   0x3   :  { %p191_p1 = scmp.lt.u32.totalorder %s187_s13, %s293_s1 }
   0x5   :  { %p193_p2 = pnand %p191_p1, %p188_p0 }
   0x7   :  { %196 = shalt.err (!%p193_p2)
}
   0x8   :  { %s197_s18 = scalar_lea.vmem %s17_s10, 640  ;;  %p202_p4 = scmp.lt.s32.totalorder %s17_s10, %s17_s10 }
   0x9   :  { %p198_p3 = scmp.ne.s32.totalorder %s17_s10, %s197_s18  ;;  %p203_p5 = scmp.lt.s32.totalorder %s197_s18, %s197_s18 }
   0xb   :  { %p204_p6 = por %p203_p5, %p202_p4 }
   0xd   :  { %p205_p7 = pnand %p204_p6, %p198_p3 }
   0xf   :  { %208 = shalt.err (!%p205_p7)
}
  0x10   :  { %s236_s19 = smov 128   ;;  %s237_s20 = smov 8  }
  0x11   :  { %22 = dma.hbm_to_vmem [thread:$0]  %s293_s1, 640, %s17_s10, [#allocation3], %s236_s19, %s236_s19, %s237_s20  }
  0x12   :  { %231 = dma.done.wait [#allocation3], 640  }
  0x13   :  { %232 = vsyncadd [#allocation3], 4294966656  ;;  %v238_v0 = vmov 0   ;;  %v26_v1 = vld [vmem:[%s292_s0] sm:$0xff]  ;;  %v43_v3 = vld [vmem:[#allocation2 + $0x8] sm:$0xff]  ;;  %v28_v10 = vlaneseq  ;;  %vm47_vm0 = vcmask 326656  }
  0x14   :  { %186 = vset.pattern.permute.xlu0 %v238_v0  ;;  %v42_v2 = vld [vmem:[#allocation2] sm:$0xff]  ;;  %v44_v4 = vld [vmem:[#allocation2 + $0x10] sm:$0xff]  ;;  %v45_v5 = vld [vmem:[#allocation2 + $0x18] sm:$0xff]  ;;  %v239_v13 = vmov 0.0  }
  0x15   :  { %31 = vperm.xlu0 %186, %v26_v1   ;;  %v27_v6 = vld [vmem:[%s292_s0 + $0x8] sm:$0xff]  ;;  %v172_v7 = vpack.c.bf16 %v43_v3, %v42_v2  ;;  %v176_v8 = vpack.c.bf16 %v45_v5, %v44_v4  ;;  %v46_v9 = vld [vmem:[#allocation2 + $0x20] sm:$0xff]  ;;  %v29_v11 = vand.u32 127, %v28_v10  ;;  %s240_s0 = smov [#allocation5]  }
  0x16   :  { %s136_s1 = sshll.u32 %s240_s0, 4  ;;  %s137_s1 = int_to_ptr.vmem [resolvable:$true] %s136_s1 }
  0x17   :  { %173 = vmatprep.subr.bf16.mxu0 %v172_v7  ;;  %s209_s27 = scalar_lea.vmem %s137_s1, 256  ;;  %p214_p9 = scmp.lt.s32.totalorder %s137_s1, %s137_s1 }
  0x18   :  { %175 = vmatpush3.bf16.msra.mxu0 %v172_v7  ;;  %p210_p8 = scmp.ne.s32.totalorder %s137_s1, %s209_s27  ;;  %p215_p10 = scmp.lt.s32.totalorder %s209_s27, %s209_s27 }
  0x19   :  { %34 = vperm.xlu0 %186, %v27_v6   ;;  %177 = vmatprep.subr.bf16.mxu0 %v176_v8 }
  0x1a   :  { %p216_p11 = por %p215_p10, %p214_p9 }
  0x1c   :  { %179 = vmatpush3.bf16.msra.mxu0 %v176_v8  ;;  %p217_p12 = pnand %p216_p11, %p210_p8 }
  0x1d   :  { %167 = vmatprep.subr.mxu0 %v46_v9 }
  0x20   :  { %168 = vmatpush3.msra.mxu0 %v46_v9 }
  0x94   :  { %v32_v12 = vpop.permute.xlu0 %31 }
  0x95   :  { %vm36_vm1 = vcmp.eq.s32.totalorder %v32_v12, %v29_v11 }
  0x96   :  { %v148_v14 = vsel %vm36_vm1, 1.0, %v239_v13 }
  0x97   :  { %169 = vmatprep.mubr.msk.f32.mxu0 %vm47_vm0, %v148_v14 }
  0x98   :  { %v35_v15 = vpop.permute.xlu0 %34 }
  0x99   :  { %vm37_vm2 = vcmp.eq.s32.totalorder %v35_v15, %v29_v11 }
  0x9a   :  { %v149_v16 = vsel %vm37_vm2, 1.0, %v239_v13 }
  0x9b   :  { %170 = vmatmul.mubr.msk.f32.vlgmr.msra.gmra.mrb[0].mxu0 %vm47_vm0, %v149_v16 }
 0x16e   :  { %v171_v17 = vpop.f32.mrb[0].mxu0 }
 0x16f   :  { %130 = vst [vmem:[#allocation5 + $0x8] sm:$0xff] %v171_v17  ;;  %v120_v18 = vpop.f32.mrb[1].mxu0 }
 0x170   :  { %129 = vst [vmem:[#allocation5] sm:$0xff] %v120_v18 }
 0x171   :  { %220 = shalt.err (!%p217_p12)
}
 0x172   :  { %s221_s30 = scalar_lea.hbm %s294_s2, 256 }
 0x173   :  { %p222_p13 = scmp.ne.s32.totalorder %s294_s2, %s221_s30  ;;  %p225_p0 = scmp.lt.u32.totalorder %s221_s30, %s294_s2 }
 0x175   :  { %p227_p1 = pnand %p225_p0, %p222_p13 }
 0x177   :  { %230 = shalt.err (!%p227_p1)
}
 0x178   :  { %142 = dma.vmem_to_hbm [thread:$0]  %s137_s1, 256, %s294_s2, [#allocation4], %s236_s19, %s236_s19, %s237_s20  }
 0x179   :  { %233 = dma.done.wait [#allocation4], 256  }
 0x17a   :  { %234 = vsyncadd [#allocation4], 4294967040 }
 0x17b   :  { %146 = vsyncpa [#allocation3], 1 }
 0x17c   :  { %147 = vsyncpa [#allocation4], 1 }

</bundles_post_ra>
